<compile_context>
chip_gen: v6e
topology: v6e:2x2x1
jax: 0.10.0
libtpu: 0.0.40
codegen_flags: <defaults>
</compile_context>

<pallas_src>
import functools

import jax
import jax.numpy as jnp
from jax.experimental import pallas as pl
from jax.experimental.pallas import tpu as pltpu

LANE = 128
SUB = 8
MAX_BLOCK_BYTES = 2 * 1024 * 1024  # target input bytes per grid step (per buffer)


def identity_kernel(x_ref, p_ref, o_ref, acc_ref, *, rows_in_last):
    """Streaming reduction across the grid.

    acc_ref is a full-block f32 VMEM accumulator (pure VPU += per step, no per-step
    XLU reduce / scalar chain).  The final cross-lane reduce + output write happen
    only on the last grid step.  When the last block is ragged, its out-of-bounds
    rows are masked to zero before accumulation.
    """
    i = pl.program_id(0)
    last = pl.num_programs(0) - 1

    @pl.when(i == 0)
    def _():
        acc_ref[...] = jnp.zeros_like(acc_ref)

    x = x_ref[...].astype(jnp.float32)
    block_rows = x.shape[0]

    if rows_in_last == block_rows:
        # All blocks are full: unconditional VPU add.
        acc_ref[...] += x
    else:
        # Ragged last block: mask out-of-bounds rows (their contents are undefined).
        @pl.when(i != last)
        def _():
            acc_ref[...] += x

        @pl.when(i == last)
        def _():
            row = jax.lax.broadcasted_iota(jnp.int32, x.shape, 0)
            acc_ref[...] += jnp.where(row < rows_in_last, x, 0.0)

    @pl.when(i == last)
    def _():
        total = jnp.sum(acc_ref[...])  # single XLU reduce for the whole kernel
        o_ref[...] = (p_ref[...].astype(jnp.float32) + 0.0 * total).astype(o_ref.dtype)


def identity_forward(inputs, param_x):
    """JAX/Pallas equivalent of Identity.forward: param_x + 0.0 * sum(inputs)."""
    dim = param_x.shape[0]
    out_dtype = jnp.result_type(param_x.dtype, inputs.dtype)
    p2 = param_x.reshape(1, dim)

    x_flat = inputs.reshape(-1)  # contiguous reshape: free
    n = x_flat.size
    rows = n // LANE
    rem = n - rows * LANE

    extra = None  # sub-lane tail summed in the wrapper (< 128 elements, negligible)
    if rows == 0:
        # Whole input smaller than one (8,128) tile: pad just this tiny array.
        x_main = jnp.pad(x_flat, (0, SUB * LANE - n))
        rows = SUB
    elif rem != 0:
        # n not lane-aligned (rare for NN tensors): aligned prefix goes through the
        # kernel; the <128-element tail is folded in the wrapper.
        # TODO(synk): the prefix slice may materialize an HBM copy for non-lane-aligned n.
        x_main = x_flat[: rows * LANE]
        extra = x_flat[rows * LANE:]
    else:
        x_main = x_flat  # lane-aligned: the 2-D reshape below is free (no HBM copy)

    x2 = x_main.reshape(rows, LANE)  # lane-dense (rows, 128) view

    itemsize = jnp.dtype(x2.dtype).itemsize
    max_rows = max(SUB, (MAX_BLOCK_BYTES // (LANE * itemsize)) // SUB * SUB)
    if rows <= max_rows:
        block_rows = rows           # single block; full-dim block shape is always legal
        grid_n = 1
    else:
        block_rows = max_rows       # multiple of 8 (sublane constraint)
        grid_n = pl.cdiv(rows, block_rows)
    rows_in_last = rows - (grid_n - 1) * block_rows  # static; == block_rows if not ragged

    out = pl.pallas_call(
        functools.partial(identity_kernel, rows_in_last=rows_in_last),
        out_shape=jax.ShapeDtypeStruct((1, dim), out_dtype),
        grid_spec=pltpu.PrefetchScalarGridSpec(
            num_scalar_prefetch=0,
            grid=(grid_n,),
            in_specs=[
                pl.BlockSpec((block_rows, LANE), lambda i: (i, 0)),  # streamed input
                pl.BlockSpec((1, dim), lambda i: (0, 0)),            # param (resident)
            ],
            out_specs=pl.BlockSpec((1, dim), lambda i: (0, 0)),      # output (resident)
            scratch_shapes=[pltpu.VMEM((block_rows, LANE), jnp.float32)],
        ),
        # Reduction axis -> "arbitrary".
        # TODO(synk): on v7x, a leading size-2 "parallel" axis with per-core partial
        # accumulators could use both TensorCores for very large inputs.
        compiler_params=pltpu.CompilerParams(dimension_semantics=("arbitrary",)),
    )(x2, p2)

    out = out.reshape(dim)
    if extra is not None:
        out = out + (0.0 * jnp.sum(extra.astype(jnp.float32))).astype(out_dtype)
    return out


if __name__ == "__main__":
    key = jax.random.PRNGKey(0)
    # Small shapes consistent with the module: dim=32, NCHW input (2, 4, 16, 16).
    dim = 32
    init = 0.5
    param_x = init * jnp.ones([dim], dtype=jnp.float32)  # deterministic init
    x = jax.random.normal(key, (2, 4, 16, 16), dtype=jnp.float32)

    fwd = jax.jit(identity_forward)
    out = jax.block_until_ready(fwd(x, param_x))

    ref = param_x + 0.0 * jnp.sum(x)
    assert out.shape == (dim,)
    assert jnp.allclose(out, ref, atol=1e-5), (out, ref)
    print("KERNEL_OK")
</pallas_src>

<mosaic_0001>
module attributes {stable_mosaic.version = 11 : i64} {
  func.func @identity_kernel(%arg0: i32, %arg1: memref<16x128xf32, #tpu.memory_space<vmem>>, %arg2: memref<1x32xf32, #tpu.memory_space<vmem>>, %arg3: memref<1x32xf32, #tpu.memory_space<vmem>>, %arg4: memref<16x128xf32, #tpu.memory_space<vmem>>) attributes {dimension_semantics = [#tpu.dimension_semantics<arbitrary>], iteration_bounds = array<i64: 1>, scalar_prefetch = 0 : i64, scratch_operands = 1 : i64, tpu.core_type = #tpu.core_type<tc>, window_params = [{transform_indices = @transform_0, window_bounds = array<i64: 16, 128>}, {pipeline_mode = #tpu.pipeline_mode<synchronous>, transform_indices = @transform_1, window_bounds = array<i64: 1, 32>}, {pipeline_mode = #tpu.pipeline_mode<synchronous>, transform_indices = @transform_2, window_bounds = array<i64: 1, 32>}]} {
    %c0_i32 = arith.constant 0 : i32
    %0 = arith.cmpi eq, %arg0, %c0_i32 : i32
    %1 = arith.extui %0 : i1 to i32
    %c0_i32_0 = arith.constant 0 : i32
    %2 = arith.cmpi ne, %1, %c0_i32_0 : i32
    scf.if %2 {
      %cst = arith.constant 0.000000e+00 : f32
      %10 = vector.broadcast %cst : f32 to vector<16x128xf32>
      %c0_8 = arith.constant 0 : index
      %c0_9 = arith.constant 0 : index
      %11 = vector.load %arg4[%c0_8, %c0_9] : memref<16x128xf32, #tpu.memory_space<vmem>>, vector<16x128xf32>
      tpu.vector_store %arg4[%c0_8, %c0_9], %10 {strides = array<i32>} : memref<16x128xf32, #tpu.memory_space<vmem>>, vector<16x128xf32>,
    } else {
    }
    %c0 = arith.constant 0 : index
    %c0_1 = arith.constant 0 : index
    %3 = vector.load %arg1[%c0, %c0_1] : memref<16x128xf32, #tpu.memory_space<vmem>>, vector<16x128xf32>
    %c0_2 = arith.constant 0 : index
    %c0_3 = arith.constant 0 : index
    %4 = vector.load %arg4[%c0_2, %c0_3] : memref<16x128xf32, #tpu.memory_space<vmem>>, vector<16x128xf32>
    %5 = arith.addf %4, %3 : vector<16x128xf32>
    %c0_4 = arith.constant 0 : index
    %c0_5 = arith.constant 0 : index
    %6 = vector.load %arg4[%c0_4, %c0_5] : memref<16x128xf32, #tpu.memory_space<vmem>>, vector<16x128xf32>
    tpu.vector_store %arg4[%c0_4, %c0_5], %5 {strides = array<i32>} : memref<16x128xf32, #tpu.memory_space<vmem>>, vector<16x128xf32>,
    %c0_i32_6 = arith.constant 0 : i32
    %7 = arith.cmpi eq, %arg0, %c0_i32_6 : i32
    %8 = arith.extui %7 : i1 to i32
    %c0_i32_7 = arith.constant 0 : i32
    %9 = arith.cmpi ne, %8, %c0_i32_7 : i32
    scf.if %9 {
      %c0_8 = arith.constant 0 : index
      %c0_9 = arith.constant 0 : index
      %10 = vector.load %arg4[%c0_8, %c0_9] : memref<16x128xf32, #tpu.memory_space<vmem>>, vector<16x128xf32>
      %11 = vector.shape_cast %10 : vector<16x128xf32> to vector<1x16x128xf32>
      %cst = arith.constant dense<0.000000e+00> : vector<1xf32>
      %12 = vector.multi_reduction <add>, %11, %cst [1, 2] : vector<1x16x128xf32> to vector<1xf32>
      %13 = vector.shape_cast %12 : vector<1xf32> to vector<1x1x1xf32>
      %14 = vector.extract %13[0, 0, 0] : f32 from vector<1x1x1xf32>
      %c0_10 = arith.constant 0 : index
      %c0_11 = arith.constant 0 : index
      %15 = vector.load %arg2[%c0_10, %c0_11] : memref<1x32xf32, #tpu.memory_space<vmem>>, vector<1x32xf32>
      %cst_12 = arith.constant 0.000000e+00 : f32
      %16 = arith.mulf %cst_12, %14 : f32
      %17 = vector.broadcast %16 : f32 to vector<1x32xf32>
      %18 = arith.addf %15, %17 : vector<1x32xf32>
      %c0_13 = arith.constant 0 : index
      %c0_14 = arith.constant 0 : index
      %19 = vector.load %arg3[%c0_13, %c0_14] : memref<1x32xf32, #tpu.memory_space<vmem>>, vector<1x32xf32>
      tpu.vector_store %arg3[%c0_13, %c0_14], %18 {strides = array<i32>} : memref<1x32xf32, #tpu.memory_space<vmem>>, vector<1x32xf32>,
    } else {
    }
    return
  }
  func.func @transform_0(%arg0: i32) -> (i32, i32) {
    %c0_i32 = arith.constant 0 : i32
    %c0_i32_0 = arith.constant 0 : i32
    return %arg0, %c0_i32 : i32, i32
  }
  func.func @transform_1(%arg0: i32) -> (i32, i32) {
    %c0_i32 = arith.constant 0 : i32
    %c0_i32_0 = arith.constant 0 : i32
    %c0_i32_1 = arith.constant 0 : i32
    return %c0_i32, %c0_i32_0 : i32, i32
  }
  func.func @transform_2(%arg0: i32) -> (i32, i32) {
    %c0_i32 = arith.constant 0 : i32
    %c0_i32_0 = arith.constant 0 : i32
    %c0_i32_1 = arith.constant 0 : i32
    return %c0_i32, %c0_i32_0 : i32, i32
  }
}

</mosaic_0001>

<bundles_post_ra>
// kernel: identity_forward.1
= control target key start
LH: loop header
LB: loop body
LE: loop exit
PB: predicated region body
PF: predicated region fallthrough
CT: control target
= control target key end

     0   :  { %s114_s0 = inlined_call_operand.vmem [shape: f32[16,128], index: 0, kind: input, shape index: {}]   ;;  %s115_s1 = inlined_call_operand.vmem [shape: f32[1,32], index: 1, kind: input, shape index: {}]   ;;  %s116_s2 = inlined_call_operand.hbm [shape: f32[1,32], index: 2, kind: output, shape index: {}]  }
   0x1   :  { %v18_v0 = vld [vmem:[%s114_s0] sm:$0xff]  ;;  %v19_v1 = vld [vmem:[%s114_s0 + $0x8] sm:$0xff] }
   0x2   :  { %7 = vsyncpa [#allocation4], 0  ;;  %v31_v2 = vadd.f32 %v19_v1, %v18_v0  ;;  %v41_v10 = vld [vmem:[%s115_s1] sm:$0x1]  ;;  %s86_s17 = smov [#allocation3]   ;;  %vm45_vm0 = vcmask 253952  }
   0x3   :  { %s53_s18 = sshll.u32 %s86_s17, 4  ;;  %s54_s18 = int_to_ptr.vmem [resolvable:$true] %s53_s18 }
   0x4   :  { %32 = vadd.xlane.f32.xlu0 %v31_v2  ;;  %s64_s0 = scalar_lea.vmem %s54_s18, 16  ;;  %s68_s19 = scalar_lea.vmem %s54_s18, 32 }
   0x5   :  { %p65_p0 = scmp.ne.s32.totalorder %s54_s18, %s64_s0  ;;  %p69_p1 = scmp.lt.s32.totalorder %s54_s18, %s54_s18 }
   0x6   :  { %p70_p2 = scmp.lt.s32.totalorder %s68_s19, %s64_s0 }
   0x8   :  { %p71_p3 = por %p70_p2, %p69_p1 }
   0xa   :  { %p72_p4 = pnand %p71_p3, %p65_p0 }
  0x8d   :  { %v33_v3 = vpop.xlane.xlu0 %32 }
  0x8e   :  { %v34_v4 = vrot.slane %v33_v3, 4 }
  0x90   :  { %v35_v5 = vadd.f32 %v34_v4, %v33_v3 }
  0x92   :  { %v36_v6 = vrot.slane %v35_v5, 2 }
  0x94   :  { %v37_v7 = vadd.f32 %v36_v6, %v35_v5 }
  0x96   :  { %v38_v8 = vrot.slane %v37_v7, 1 }
  0x98   :  { %v39_v9 = vadd.f32 %v38_v8, %v37_v7 }
  0x9a   :  { %61 = vpush %v39_v9 }
  0xcb   :  { %s62_s13 = spop %61 }
  0xcc   :  { %s42_s16 = smul.f32 0.0, %s62_s13 }
  0xce   :  { %v43_v11 = vstv %s42_s16 }
  0xcf   :  { %v44_v12 = vadd.f32 %v43_v11, %v41_v10 }
  0xd1   :  { %46 = vst.msk [vmem:[#allocation3] sm:$0x1] %vm45_vm0, %v44_v12 }
  0xd2   :  { %75 = shalt.err (!%p72_p4)
}
  0xd3   :  { %56 = dma.vmem_to_hbm [thread:$0]  %s54_s18, 16, %s116_s2, [#allocation4]  }
  0xd4   :  { %84 = dma.done.wait [#allocation4], 16  }
  0xd5   :  { %85 = vsyncadd [#allocation4], 4294967280 }
  0xd6   :  { %60 = vsyncpa [#allocation4], 1 }

</bundles_post_ra>
